<compile_context>
chip_gen: v6e
topology: v6e:2x2x1
jax: 0.10.0
libtpu: 0.0.40
codegen_flags: <defaults>
</compile_context>

<pallas_src>
from functools import partial

import jax
import jax.numpy as jnp
from jax.experimental import pallas as pl
from jax.experimental.pallas import tpu as pltpu


# ----------------------------------------------------------------------------
# Path 1: single gridless invocation (small inputs).
# ----------------------------------------------------------------------------
def _loss_meanstd_single_kernel(out_ref, tgt_ref, res_ref, frac_ref, *, n_total):
    # In-kernel upcast: inputs arrive in their native dtype (free vs the
    # mem-bound roofline; avoids a wrapper-side cast that doubles HBM bytes
    # for bf16/fp8 inputs).
    o = out_ref[...].astype(jnp.float32)
    t = tgt_ref[...].astype(jnp.float32)
    diff = o - t
    loss = diff * diff                          # elementwise MSE, no reduction

    n = jnp.float32(n_total)
    mean = jnp.sum(loss) / n
    # Two-pass variance (loss is resident in vregs), unbiased (N-1) like torch.
    centered = loss - mean
    var = jnp.sum(centered * centered) / (n - 1.0)
    std = jnp.sqrt(jnp.maximum(var, 0.0))
    thresh = 1.5 * std + mean

    mask = (loss < thresh).astype(jnp.float32)
    masked_sum = jnp.sum(loss * mask)
    masked_cnt = jnp.sum(mask)

    # NOTE: if no element passes the mask, this is 0/0 = NaN, matching the
    # PyTorch reference's empty-selection mean behavior.
    res_ref[0, 0] = masked_sum / masked_cnt     # reducer = mean(loss[mask])
    frac_ref[0, 0] = masked_cnt / n             # progress_tracker entry


def _loss_mean_std_single(o2, t2, n_total):
    return pl.pallas_call(
        partial(_loss_meanstd_single_kernel, n_total=float(n_total)),
        out_shape=(
            jax.ShapeDtypeStruct((1, 1), jnp.float32),
            jax.ShapeDtypeStruct((1, 1), jnp.float32),
        ),
        in_specs=[
            pl.BlockSpec(memory_space=pltpu.MemorySpace.VMEM),
            pl.BlockSpec(memory_space=pltpu.MemorySpace.VMEM),
        ],
        out_specs=(
            pl.BlockSpec(memory_space=pltpu.MemorySpace.SMEM),
            pl.BlockSpec(memory_space=pltpu.MemorySpace.SMEM),
        ),
    )(o2, t2)


# ----------------------------------------------------------------------------
# Path 2: scalable 2-phase tiled kernel (large inputs).
# ----------------------------------------------------------------------------
def _loss_meanstd_tiled_kernel(out_ref, tgt_ref, res_ref, frac_ref,
                               sum_acc, sq_acc, msum_acc, mcnt_acc, thr_ref,
                               *, n_total):
    phase = pl.program_id(0)
    i = pl.program_id(1)
    n_tiles = pl.num_programs(1)

    o = out_ref[...].astype(jnp.float32)
    t = tgt_ref[...].astype(jnp.float32)
    diff = o - t
    loss = diff * diff                          # (tile_rows, 128)

    @pl.when(jnp.logical_and(phase == 0, i == 0))
    def _init():
        sum_acc[...] = jnp.zeros_like(sum_acc)
        sq_acc[...] = jnp.zeros_like(sq_acc)
        msum_acc[...] = jnp.zeros_like(msum_acc)
        mcnt_acc[...] = jnp.zeros_like(mcnt_acc)

    @pl.when(phase == 0)
    def _acc_stats():
        # Full-tile vector accumulation: pure VPU adds in the steady state;
        # no per-tile cross-lane reduce, no SMEM sst->sld dependence chain.
        sum_acc[...] += loss
        sq_acc[...] += loss * loss

    @pl.when(jnp.logical_and(phase == 1, i == 0))
    def _compute_thresh():
        # One-shot epilogue reduce + scalar math at the phase boundary;
        # threshold is stashed once in SMEM and only read per phase-1 tile.
        n = jnp.float32(n_total)
        s = jnp.sum(sum_acc[...])
        ss = jnp.sum(sq_acc[...])
        mean = s / n
        # Unbiased (N-1), single-pass formula; the tile-wide split accumulator
        # keeps f32 accumulation error small for realistic sizes.
        var = (ss - n * mean * mean) / (n - 1.0)
        std = jnp.sqrt(jnp.maximum(var, 0.0))
        thr_ref[0] = 1.5 * std + mean

    @pl.when(phase == 1)
    def _acc_masked():
        # TODO(synk): for mid-size inputs, keep the phase-0 loss resident in
        # VMEM (size threshold is per-generation: ~24 MiB v7x, ~48+ MiB v6e)
        # instead of re-streaming outputs/targets from HBM here.
        thresh = thr_ref[0]                     # scalar, written exactly once
        mask = (loss < thresh).astype(jnp.float32)
        msum_acc[...] += loss * mask
        mcnt_acc[...] += mask

    @pl.when(jnp.logical_and(phase == 1, i == n_tiles - 1))
    def _finalize():
        masked_sum = jnp.sum(msum_acc[...])
        masked_cnt = jnp.sum(mcnt_acc[...])
        res_ref[0, 0] = masked_sum / masked_cnt
        frac_ref[0, 0] = masked_cnt / jnp.float32(n_total)


def _loss_mean_std_tiled(o2, t2, n_total, *, tile_rows):
    rows = o2.shape[0]
    assert tile_rows % 8 == 0, "tile_rows must be a multiple of 8 sublanes"
    assert rows % tile_rows == 0, "rows must be a multiple of tile_rows"
    n_tiles = rows // tile_rows

    # TODO(synk): on v7x, shard the tile axis across the 2 TensorCores with
    # per-core partial accumulators + a cross-core combine before phase 1.
    return pl.pallas_call(
        partial(_loss_meanstd_tiled_kernel, n_total=float(n_total)),
        out_shape=(
            jax.ShapeDtypeStruct((1, 1), jnp.float32),
            jax.ShapeDtypeStruct((1, 1), jnp.float32),
        ),
        grid_spec=pltpu.PrefetchScalarGridSpec(
            num_scalar_prefetch=0,
            grid=(2, n_tiles),                  # (phase, tile) -- sequential
            in_specs=[
                pl.BlockSpec((tile_rows, 128), lambda p, i: (i, 0)),
                pl.BlockSpec((tile_rows, 128), lambda p, i: (i, 0)),
            ],
            out_specs=(
                pl.BlockSpec(memory_space=pltpu.MemorySpace.SMEM),
                pl.BlockSpec(memory_space=pltpu.MemorySpace.SMEM),
            ),
            scratch_shapes=[
                pltpu.VMEM((tile_rows, 128), jnp.float32),   # sum(loss)
                pltpu.VMEM((tile_rows, 128), jnp.float32),   # sum(loss^2)
                pltpu.VMEM((tile_rows, 128), jnp.float32),   # sum(loss*mask)
                pltpu.VMEM((tile_rows, 128), jnp.float32),   # sum(mask)
                pltpu.SMEM((1,), jnp.float32),               # threshold
            ],
        ),
        compiler_params=pltpu.CompilerParams(
            dimension_semantics=("arbitrary", "arbitrary"),
        ),
    )(o2, t2)


# ----------------------------------------------------------------------------
# Public wrapper.
# ----------------------------------------------------------------------------
def loss_mean_std(outputs, targets, *, tile_rows=512,
                  single_shot_max_bytes=4 << 20):
    """Returns (mean(loss[mask]), kept_fraction) as float32 scalars."""
    n = outputs.size
    assert n % 128 == 0, "flattened size must be a multiple of 128 lanes"
    rows = n // 128

    # Lane-dense row-major flatten; keep native dtype (upcast happens in-kernel).
    o2 = outputs.reshape(rows, 128)
    t2 = targets.reshape(rows, 128)

    in_bytes = 2 * rows * 128 * outputs.dtype.itemsize
    if in_bytes <= single_shot_max_bytes:
        res, frac = _loss_mean_std_single(o2, t2, n)
    else:
        tr = min(tile_rows, rows)
        res, frac = _loss_mean_std_tiled(o2, t2, n, tile_rows=tr)
    return res[0, 0], frac[0, 0]


def _reference(outputs, targets):
    loss = (outputs.astype(jnp.float32) - targets.astype(jnp.float32)) ** 2
    mean = loss.mean()
    std = jnp.std(loss, ddof=1)
    mask = loss < 1.5 * std + mean
    kept_frac = mask.sum() / mask.size
    return loss[mask].mean(), kept_frac


if __name__ == "__main__":
    key = jax.random.PRNGKey(0)
    k1, k2 = jax.random.split(key)

    # NCHW: batch=2, channels=4, spatial=16x16 -> 2048 elements (single-shot path)
    outputs = jax.random.normal(k1, (2, 4, 16, 16), dtype=jnp.float32)
    targets = jax.random.normal(k2, (2, 4, 16, 16), dtype=jnp.float32)

    res, frac = loss_mean_std(outputs, targets)
    jax.block_until_ready((res, frac))
    ref_res, ref_frac = _reference(outputs, targets)
    assert jnp.allclose(res, ref_res, rtol=1e-5, atol=1e-6), (res, ref_res)
    assert jnp.allclose(frac, ref_frac, rtol=1e-6, atol=1e-6), (frac, ref_frac)

    # Also exercise the scalable tiled path (force it with a tiny cap).
    k3, k4 = jax.random.split(k2)
    big_out = jax.random.normal(k3, (4, 8, 32, 32), dtype=jnp.float32)  # 32768 elems
    big_tgt = jax.random.normal(k4, (4, 8, 32, 32), dtype=jnp.float32)
    res2, frac2 = loss_mean_std(big_out, big_tgt, tile_rows=128,
                                single_shot_max_bytes=0)
    jax.block_until_ready((res2, frac2))
    ref_res2, ref_frac2 = _reference(big_out, big_tgt)
    # Slightly looser tolerance: the hard threshold can flip a boundary element
    # between the kernel's one-pass stats and the two-pass reference.
    assert jnp.allclose(res2, ref_res2, rtol=5e-4, atol=5e-4), (res2, ref_res2)
    assert jnp.allclose(frac2, ref_frac2, rtol=0.0, atol=1e-4), (frac2, ref_frac2)

    print("KERNEL_OK")
</pallas_src>

<mosaic_0001>
module attributes {stable_mosaic.version = 11 : i64} {
  func.func @_loss_meanstd_single_kernel(%arg0: memref<16x128xf32, #tpu.memory_space<vmem>>, %arg1: memref<16x128xf32, #tpu.memory_space<vmem>>, %arg2: memref<1x1xf32, #tpu.memory_space<smem>>, %arg3: memref<1x1xf32, #tpu.memory_space<smem>>) attributes {dimension_semantics = [], scalar_prefetch = 0 : i64, scratch_operands = 0 : i64, tpu.core_type = #tpu.core_type<tc>} {
    %c0 = arith.constant 0 : index
    %c0_0 = arith.constant 0 : index
    %0 = vector.load %arg0[%c0, %c0_0] : memref<16x128xf32, #tpu.memory_space<vmem>>, vector<16x128xf32>
    %c0_1 = arith.constant 0 : index
    %c0_2 = arith.constant 0 : index
    %1 = vector.load %arg1[%c0_1, %c0_2] : memref<16x128xf32, #tpu.memory_space<vmem>>, vector<16x128xf32>
    %2 = arith.subf %0, %1 : vector<16x128xf32>
    %3 = arith.mulf %2, %2 : vector<16x128xf32>
    %4 = vector.shape_cast %3 : vector<16x128xf32> to vector<1x16x128xf32>
    %cst = arith.constant dense<0.000000e+00> : vector<1xf32>
    %5 = vector.multi_reduction <add>, %4, %cst [1, 2] : vector<1x16x128xf32> to vector<1xf32>
    %6 = vector.shape_cast %5 : vector<1xf32> to vector<1x1x1xf32>
    %7 = vector.extract %6[0, 0, 0] : f32 from vector<1x1x1xf32>
    %cst_3 = arith.constant 2.048000e+03 : f32
    %8 = arith.divf %7, %cst_3 : f32
    %9 = vector.broadcast %8 : f32 to vector<16x128xf32>
    %10 = arith.subf %3, %9 : vector<16x128xf32>
    %11 = arith.mulf %10, %10 : vector<16x128xf32>
    %12 = vector.shape_cast %11 : vector<16x128xf32> to vector<1x16x128xf32>
    %cst_4 = arith.constant dense<0.000000e+00> : vector<1xf32>
    %13 = vector.multi_reduction <add>, %12, %cst_4 [1, 2] : vector<1x16x128xf32> to vector<1xf32>
    %14 = vector.shape_cast %13 : vector<1xf32> to vector<1x1x1xf32>
    %15 = vector.extract %14[0, 0, 0] : f32 from vector<1x1x1xf32>
    %cst_5 = arith.constant 2.048000e+03 : f32
    %cst_6 = arith.constant 1.000000e+00 : f32
    %16 = arith.subf %cst_5, %cst_6 : f32
    %17 = arith.divf %15, %16 : f32
    %cst_7 = arith.constant 0.000000e+00 : f32
    %18 = arith.maximumf %17, %cst_7 : f32
    %19 = math.sqrt %18 : f32
    %cst_8 = arith.constant 1.500000e+00 : f32
    %20 = arith.mulf %cst_8, %19 : f32
    %21 = arith.addf %20, %8 : f32
    %22 = vector.broadcast %21 : f32 to vector<16x128xf32>
    %23 = arith.cmpf olt, %3, %22 : vector<16x128xf32>
    %24 = arith.extui %23 : vector<16x128xi1> to vector<16x128xi32>
    %25 = arith.sitofp %24 : vector<16x128xi32> to vector<16x128xf32>
    %26 = arith.mulf %3, %25 : vector<16x128xf32>
    %27 = vector.shape_cast %26 : vector<16x128xf32> to vector<1x16x128xf32>
    %cst_9 = arith.constant dense<0.000000e+00> : vector<1xf32>
    %28 = vector.multi_reduction <add>, %27, %cst_9 [1, 2] : vector<1x16x128xf32> to vector<1xf32>
    %29 = vector.shape_cast %28 : vector<1xf32> to vector<1x1x1xf32>
    %30 = vector.extract %29[0, 0, 0] : f32 from vector<1x1x1xf32>
    %31 = vector.shape_cast %25 : vector<16x128xf32> to vector<1x16x128xf32>
    %cst_10 = arith.constant dense<0.000000e+00> : vector<1xf32>
    %32 = vector.multi_reduction <add>, %31, %cst_10 [1, 2] : vector<1x16x128xf32> to vector<1xf32>
    %33 = vector.shape_cast %32 : vector<1xf32> to vector<1x1x1xf32>
    %34 = vector.extract %33[0, 0, 0] : f32 from vector<1x1x1xf32>
    %35 = arith.divf %30, %34 : f32
    %c0_11 = arith.constant 0 : index
    %c0_12 = arith.constant 0 : index
    %36 = memref.load %arg2[%c0_11, %c0_12] : memref<1x1xf32, #tpu.memory_space<smem>>
    memref.store %35, %arg2[%c0_11, %c0_12] : memref<1x1xf32, #tpu.memory_space<smem>>
    %cst_13 = arith.constant 2.048000e+03 : f32
    %37 = arith.divf %34, %cst_13 : f32
    %c0_14 = arith.constant 0 : index
    %c0_15 = arith.constant 0 : index
    %38 = memref.load %arg3[%c0_14, %c0_15] : memref<1x1xf32, #tpu.memory_space<smem>>
    memref.store %37, %arg3[%c0_14, %c0_15] : memref<1x1xf32, #tpu.memory_space<smem>>
    return
  }
}

</mosaic_0001>

<bundles_post_ra>
// kernel: tpu_custom_call.1
= control target key start
LH: loop header
LB: loop body
LE: loop exit
PB: predicated region body
PF: predicated region fallthrough
CT: control target
= control target key end

     0   :  { %9 = vsyncpa [#allocation3], 0  ;;  %s298_s0 = inlined_call_operand.hbm [shape: f32[16,128], index: 0, kind: input, shape index: {}]   ;;  %s299_s1 = inlined_call_operand.hbm [shape: f32[16,128], index: 1, kind: input, shape index: {}]   ;;  %s300_s2 = inlined_call_operand.hbm [shape: f32[1,1], index: 2, kind: output, shape index: {0}]   ;;  %s301_s3 = inlined_call_operand.hbm [shape: f32[1,1], index: 3, kind: output, shape index: {1}]  }
   0x1   :  { %10 = vsyncpa [#allocation6], 0 }
   0x2   :  { %11 = vsyncpa [#allocation4], 0 }
   0x3   :  { %12 = vsyncpa [#allocation9], 0  ;;  %s251_s12 = smov [#allocation2]  }
   0x4   :  { %s18_s13 = sshll.u32 %s251_s12, 4  ;;  %s19_s13 = int_to_ptr.vmem [resolvable:$true] %s18_s13 }
   0x5   :  { %s195_s14 = scalar_lea.vmem %s19_s13, 256  ;;  %p200_p1 = scmp.lt.s32.totalorder %s19_s13, %s19_s13 }
   0x6   :  { %p196_p0 = scmp.ne.s32.totalorder %s19_s13, %s195_s14  ;;  %p201_p2 = scmp.lt.s32.totalorder %s195_s14, %s195_s14 }
   0x8   :  { %p202_p3 = por %p201_p2, %p200_p1 }
   0xa   :  { %p203_p4 = pnand %p202_p3, %p196_p0 }
   0xc   :  { %206 = shalt.err (!%p203_p4)
}
   0xd   :  { %s252_s15 = smov 128   ;;  %s253_s16 = smov 8  }
   0xe   :  { %24 = dma.hbm_to_vmem [thread:$0]  %s298_s0, 256, %s19_s13, [#allocation3], %s252_s15, %s252_s15, %s253_s16  }
   0xf   :  { %s254_s19 = smov [#allocation5]  }
  0x10   :  { %s30_s20 = sshll.u32 %s254_s19, 4  ;;  %s31_s20 = int_to_ptr.vmem [resolvable:$true] %s30_s20 }
  0x11   :  { %s215_s21 = scalar_lea.vmem %s31_s20, 256  ;;  %p220_p6 = scmp.lt.s32.totalorder %s31_s20, %s31_s20 }
  0x12   :  { %p216_p5 = scmp.ne.s32.totalorder %s31_s20, %s215_s21  ;;  %p221_p7 = scmp.lt.s32.totalorder %s215_s21, %s215_s21 }
  0x14   :  { %p222_p8 = por %p221_p7, %p220_p6 }
  0x16   :  { %p223_p9 = pnand %p222_p8, %p216_p5 }
  0x18   :  { %226 = shalt.err (!%p223_p9)
}
  0x19   :  { %36 = dma.hbm_to_vmem [thread:$0]  %s299_s1, 256, %s31_s20, [#allocation6], %s252_s15, %s252_s15, %s253_s16  }
  0x1a   :  { %243 = dma.done.wait [#allocation3], 256  }
  0x1b   :  { %244 = vsyncadd [#allocation3], 4294967040 }
  0x1c   :  { %245 = dma.done.wait [#allocation6], 256  }
  0x1d   :  { %246 = vsyncadd [#allocation6], 4294967040  ;;  %v43_v0 = vld [vmem:[#allocation2] sm:$0xff]  ;;  %v44_v1 = vld [vmem:[#allocation2 + $0x8] sm:$0xff]  ;;  %s255_s26 = smov 0.0   ;;  %v256_v36 = vmov 0.0  }
  0x1e   :  { %v45_v2 = vld [vmem:[#allocation5] sm:$0xff]  ;;  %v46_v3 = vld [vmem:[#allocation5 + $0x8] sm:$0xff]  ;;  %s257_s7 = smov [#allocation8]   ;;  %s258_s12 = smov [#allocation7]  }
  0x1f   :  { %v47_v4 = vsub.f32 %v43_v0, %v45_v2  ;;  %v48_v5 = vsub.f32 %v44_v1, %v46_v3 }
  0x21   :  { %v49_v6 = vmul.f32 %v47_v4, %v47_v4  ;;  %v50_v7 = vmul.f32 %v48_v5, %v48_v5 }
  0x23   :  { %v51_v8 = vadd.f32 %v50_v7, %v49_v6 }
  0x25   :  { %52 = vadd.xlane.f32.xlu0 %v51_v8 }
  0xae   :  { %v53_v9 = vpop.xlane.xlu0 %52 }
  0xaf   :  { %v54_v10 = vrot.slane %v53_v9, 4 }
  0xb1   :  { %v55_v11 = vadd.f32 %v54_v10, %v53_v9 }
  0xb3   :  { %v56_v12 = vrot.slane %v55_v11, 2 }
  0xb5   :  { %v57_v13 = vadd.f32 %v56_v12, %v55_v11 }
  0xb7   :  { %v58_v14 = vrot.slane %v57_v13, 1 }
  0xb9   :  { %v59_v15 = vadd.f32 %v58_v14, %v57_v13 }
  0xbb   :  { %163 = vpush %v59_v15 }
  0xec   :  { %s285_s0 = spop %163 }
  0xed   :  { %s63_s1 = smul.f32 0.00048828125, %s285_s0 }
  0xef   :  { %v64_v16 = vstv %s63_s1 }
  0xf0   :  { %v65_v17 = vsub.f32 %v49_v6, %v64_v16  ;;  %v66_v18 = vsub.f32 %v50_v7, %v64_v16 }
  0xf2   :  { %v67_v19 = vmul.f32 %v65_v17, %v65_v17  ;;  %v68_v20 = vmul.f32 %v66_v18, %v66_v18 }
  0xf4   :  { %v69_v21 = vadd.f32 %v68_v20, %v67_v19 }
  0xf6   :  { %70 = vadd.xlane.f32.xlu0 %v69_v21 }
 0x17f   :  { %v71_v22 = vpop.xlane.xlu0 %70 }
 0x180   :  { %v72_v23 = vrot.slane %v71_v22, 4 }
 0x182   :  { %v73_v24 = vadd.f32 %v72_v23, %v71_v22 }
 0x184   :  { %v74_v25 = vrot.slane %v73_v24, 2 }
 0x186   :  { %v75_v26 = vadd.f32 %v74_v25, %v73_v24 }
 0x188   :  { %v76_v27 = vrot.slane %v75_v26, 1 }
 0x18a   :  { %v77_v28 = vadd.f32 %v76_v27, %v75_v26 }
 0x18c   :  { %165 = vpush %v77_v28 }
 0x1bd   :  { %s166_s24 = spop %165 }
 0x1be   :  { %s81_s25 = smul.f32 0.0004885198, %s166_s24 }
 0x1c0   :  { %s82_s27 = smax.f32 %s255_s26, %s81_s25 }
 0x1c1   :  { %v83_v29 = vstv %s82_s27 }
 0x1c2   :  { %183 = vrsqrt.f32 %v83_v29  ;;  %vm86_vm0 = vcmp.eq.f32.partialorder %v83_v29, inf  ;;  %v89_v32 = vand.u32 2147483648, %v83_v29  ;;  %vm88_vm1 = vcmp.eq.f32.partialorder %v83_v29, 0.0 }
 0x1cf   :  { %v184_v30 = vpop.eup %183 }
 0x1d0   :  { %v85_v31 = vmul.f32 %v184_v30, %v83_v29 }
 0x1d2   :  { %v87_v33 = vsel %vm86_vm0, %v83_v29, %v85_v31 }
 0x1d3   :  { %v90_v34 = vsel %vm88_vm1, %v89_v32, %v87_v33 }
 0x1d4   :  { %167 = vpush %v90_v34 }
 0x205   :  { %s168_s28 = spop %167 }
 0x206   :  { %s92_s29 = smul.f32 1.5, %s168_s28 }
 0x208   :  { %s93_s30 = sadd.f32 %s92_s29, %s63_s1 }
 0x20a   :  { %v94_v35 = vstv %s93_s30 }
 0x20b   :  { %vm95_vm2 = vcmp.lt.f32.partialorder %v49_v6, %v94_v35  ;;  %vm96_vm3 = vcmp.lt.f32.partialorder %v50_v7, %v94_v35 }
 0x20c   :  { %v161_v37 = vsel %vm95_vm2, 1.0, %v256_v36  ;;  %v162_v38 = vsel %vm96_vm3, 1.0, %v256_v36 }
 0x20d   :  { %v101_v39 = vmul.f32 %v161_v37, %v49_v6  ;;  %v102_v40 = vmul.f32 %v162_v38, %v50_v7  ;;  %v113_v42 = vadd.f32 %v162_v38, %v161_v37 }
 0x20f   :  { %v103_v41 = vadd.f32 %v102_v40, %v101_v39 }
 0x211   :  { %104 = vadd.xlane.f32.xlu1 %v103_v41 }
 0x215   :  { %114 = vadd.xlane.f32.xlu1 %v113_v42 }
 0x29a   :  { %v105_v43 = vpop.xlane.xlu1 %104 }
 0x29b   :  { %v106_v44 = vrot.slane %v105_v43, 4 }
 0x29d   :  { %v107_v45 = vadd.f32 %v106_v44, %v105_v43 }
 0x29e   :  { %v115_v46 = vpop.xlane.xlu1 %114 }
 0x29f   :  { %v108_v47 = vrot.slane %v107_v45, 2  ;;  %v116_v48 = vrot.slane %v115_v46, 4 }
 0x2a1   :  { %v117_v49 = vadd.f32 %v116_v48, %v115_v46  ;;  %v109_v50 = vadd.f32 %v108_v47, %v107_v45 }
 0x2a3   :  { %v118_v51 = vrot.slane %v117_v49, 2  ;;  %v110_v52 = vrot.slane %v109_v50, 1 }
 0x2a5   :  { %v119_v53 = vadd.f32 %v118_v51, %v117_v49  ;;  %v111_v54 = vadd.f32 %v110_v52, %v109_v50 }
 0x2a7   :  { %169 = vpush %v111_v54  ;;  %v120_v55 = vrot.slane %v119_v53, 1 }
 0x2a9   :  { %v121_v56 = vadd.f32 %v120_v55, %v119_v53 }
 0x2ab   :  { %171 = vpush %v121_v56 }
 0x2d8   :  { %s170_s4 = spop %169 }
 0x2dc   :  { %s172_s5 = spop %171 }
 0x2dd   :  { %v123_v57 = vstv %s172_s5  ;;  %s131_s6 = smul.f32 0.00048828125, %s172_s5 }
 0x2de   :  { %185 = vrcp.f32 %v123_v57 }
 0x2df   :  { %133 = sst [smem:[#allocation8]] %s131_s6 }
 0x2e0   :  { %149 = dma.smem_to_hbm %s257_s7, 16, %s301_s3, [#allocation9]  }
 0x2eb   :  { %v186_v58 = vpop.eup %185 }
 0x2ec   :  { %173 = vpush %v186_v58 }
 0x31d   :  { %s174_s10 = spop %173 }
 0x31e   :  { %s126_s11 = smul.f32 %s174_s10, %s170_s4 }
 0x320   :  { %128 = sst [smem:[#allocation7]] %s126_s11 }
 0x321   :  { %141 = dma.smem_to_hbm %s258_s12, 16, %s300_s2, [#allocation4]  }
 0x322   :  { %247 = dma.done.wait [#allocation4], 16  }
 0x323   :  { %248 = vsyncadd [#allocation4], 4294967280 }
 0x324   :  { %249 = dma.done.wait [#allocation9], 16  }
 0x325   :  { %250 = vsyncadd [#allocation9], 4294967280 }
 0x326   :  { %156 = sfence }
 0x327   :  { %157 = vsyncpa [#allocation3], 1 }
 0x328   :  { %158 = vsyncpa [#allocation6], 1 }
 0x329   :  { %159 = vsyncpa [#allocation4], 1 }
 0x32a   :  { %160 = vsyncpa [#allocation9], 1 }

</bundles_post_ra>
